<compile_context>
chip_gen: v7x
topology: tpu7x:2x2x1
jax: 0.10.0
libtpu: 0.0.40
codegen_flags: <defaults>
</compile_context>

<pallas_src>
import math
from functools import partial
from math import ceil

import jax
import jax.numpy as jnp
from jax.experimental import pallas as pl
from jax.experimental.pallas import tpu as pltpu


def _round_up(x, m):
    return ((x + m - 1) // m) * m


# ----------------------------------------------------------------------------
# Generic fused matmul kernel (conv-as-matmul, linear)
# ----------------------------------------------------------------------------

def _matmul_kernel(x_ref, w_ref, b_ref, sc_ref, sh_ref, o_ref, *, act):
    """M x K-tiled matmul, bf16 operands, f32 accumulation directly in the
    resident output block, fused bias / eval-BN affine / activation epilogue."""
    kk = pl.program_id(1)

    @pl.when(kk == 0)
    def _():
        o_ref[...] = jnp.zeros_like(o_ref)

    o_ref[...] += jnp.dot(x_ref[...], w_ref[...],
                          preferred_element_type=jnp.float32)

    @pl.when(kk == pl.num_programs(1) - 1)
    def _():
        y = o_ref[...] + b_ref[...]          # conv / linear bias
        y = y * sc_ref[...] + sh_ref[...]    # folded eval-mode BatchNorm
        if act == "silu":
            y = y * jax.nn.sigmoid(y)
        elif act == "sigmoid":
            y = jax.nn.sigmoid(y)
        o_ref[...] = y


def matmul_fused(x, w, bias=None, scale=None, shift=None, act="none"):
    """out = act((x @ w + bias) * scale + shift);  x:(M,K)  w:(K,N)."""
    M, K = x.shape
    K2, N = w.shape
    assert K == K2
    if bias is None:
        bias = jnp.zeros((N,), jnp.float32)
    if scale is None:
        scale = jnp.ones((N,), jnp.float32)
    if shift is None:
        shift = jnp.zeros((N,), jnp.float32)

    # Lane-dense output: pad N (out channels) to a multiple of 128.
    Np = _round_up(N, 128)
    if Np != N:
        w = jnp.pad(w, ((0, 0), (0, Np - N)))
        bias = jnp.pad(bias, (0, Np - N))
        scale = jnp.pad(scale, (0, Np - N))
        shift = jnp.pad(shift, (0, Np - N))

    # K tile: multiple of 128, bf16 weight tile <= ~4 MiB, capped at 2048.
    budget = max(128, ((4 * 1024 * 1024) // (2 * Np)) // 128 * 128)
    tk = min(_round_up(K, 128), budget, 2048)
    Kp = _round_up(K, tk)
    nk = Kp // tk

    # M tile: multiple of 8, capped at 256 rows (parallel axis).
    tm = min(_round_up(M, 8), 256)
    Mp = _round_up(M, tm)
    nm = Mp // tm

    xb = x.astype(jnp.bfloat16)
    wb = w.astype(jnp.bfloat16)
    if (Mp, Kp) != (M, K):
        xb = jnp.pad(xb, ((0, Mp - M), (0, Kp - K)))
    if Kp != K:
        wb = jnp.pad(wb, ((0, Kp - K), (0, 0)))

    out = pl.pallas_call(
        partial(_matmul_kernel, act=act),
        out_shape=jax.ShapeDtypeStruct((Mp, Np), jnp.float32),
        grid=(nm, nk),
        in_specs=[
            pl.BlockSpec((tm, tk), lambda i, kk: (i, kk)),
            pl.BlockSpec((tk, Np), lambda i, kk: (kk, 0)),
            pl.BlockSpec((1, Np), lambda i, kk: (0, 0)),
            pl.BlockSpec((1, Np), lambda i, kk: (0, 0)),
            pl.BlockSpec((1, Np), lambda i, kk: (0, 0)),
        ],
        out_specs=pl.BlockSpec((tm, Np), lambda i, kk: (i, 0)),
        compiler_params=pltpu.CompilerParams(
            dimension_semantics=("parallel", "arbitrary")),
    )(xb, wb,
      bias.reshape(1, Np).astype(jnp.float32),
      scale.reshape(1, Np).astype(jnp.float32),
      shift.reshape(1, Np).astype(jnp.float32))
    if (Mp, Np) != (M, N):
        out = out[:M, :N]
    return out


# ----------------------------------------------------------------------------
# Depthwise conv kernel (stride handled via phase decomposition)
# ----------------------------------------------------------------------------

def _depthwise_kernel(*refs, k, stride, act):
    # refs = (phase refs (s*s of them, each (1, Hph, Wph, C)),
    #         w_ref (k, k, C), sc_ref (1, C), sh_ref (1, C), o_ref (1,Ho,Wo,C))
    s = stride
    nphase = s * s
    ph_refs = refs[:nphase]
    w_ref, sc_ref, sh_ref, o_ref = refs[nphase:]
    _, Ho, Wo, C = o_ref.shape

    phvals = [r[...] for r in ph_refs]          # each (1, Hph, Wph, C)
    wv = w_ref[...]                             # (k, k, C)

    acc = jnp.zeros((1, Ho, Wo, C), jnp.float32)
    for i in range(k):
        for j in range(k):
            ph = phvals[(i % s) * s + (j % s)]
            ii, jj = i // s, j // s
            tap = ph[:, ii:ii + Ho, jj:jj + Wo, :]
            acc = acc + tap * wv[i, j][None, None, None, :]

    y = acc * sc_ref[...].reshape(1, 1, 1, C) + sh_ref[...].reshape(1, 1, 1, C)
    if act == "silu":
        y = y * jax.nn.sigmoid(y)
    o_ref[...] = y.astype(o_ref.dtype)


def depthwise_conv_bn_act(x, w, scale, shift, stride, padding, act="silu"):
    """Depthwise kxk conv (groups=C) + fused eval-BN affine + SiLU."""
    N, H, W, C = x.shape
    k = w.shape[0]
    s = stride
    Ho = (H + 2 * padding - k) // s + 1
    Wo = (W + 2 * padding - k) // s + 1

    xp = jnp.pad(x, ((0, 0), (padding, padding), (padding, padding), (0, 0)))
    Hp, Wp = xp.shape[1], xp.shape[2]
    Hp2, Wp2 = _round_up(Hp, s), _round_up(Wp, s)
    if (Hp2, Wp2) != (Hp, Wp):
        xp = jnp.pad(xp, ((0, 0), (0, Hp2 - Hp), (0, Wp2 - Wp), (0, 0)))
    Hph, Wph = Hp2 // s, Wp2 // s

    # s*s phase views of the padded input -> the kernel runs stride-1 math
    # and produces only the strided output positions (no wasted work).
    phases = []
    for pi in range(s):
        for pj in range(s):
            phases.append(xp[:, pi::s, pj::s, :].astype(jnp.float32))

    in_specs = (
        [pl.BlockSpec((1, Hph, Wph, C), lambda n: (n, 0, 0, 0))] * (s * s)
        + [pl.BlockSpec((k, k, C), lambda n: (0, 0, 0)),
           pl.BlockSpec((1, C), lambda n: (0, 0)),
           pl.BlockSpec((1, C), lambda n: (0, 0))])

    out = pl.pallas_call(
        partial(_depthwise_kernel, k=k, stride=s, act=act),
        out_shape=jax.ShapeDtypeStruct((N, Ho, Wo, C), jnp.float32),
        grid=(N,),
        in_specs=in_specs,
        out_specs=pl.BlockSpec((1, Ho, Wo, C), lambda n: (n, 0, 0, 0)),
        compiler_params=pltpu.CompilerParams(
            dimension_semantics=("parallel",)),
    )(*phases,
      w.astype(jnp.float32),
      scale.reshape(1, C).astype(jnp.float32),
      shift.reshape(1, C).astype(jnp.float32))
    return out


# ----------------------------------------------------------------------------
# Fused Squeeze-Excitation gate kernel: pool + 1x1 -> SiLU -> 1x1 -> Sigmoid
# ----------------------------------------------------------------------------

def _se_kernel(x_ref, w1_ref, b1_ref, w2_ref, b2_ref, g_ref):
    # x_ref: (1, HW, C); w1: (C, Rp); w2: (Rp, C); g_ref: (1, C)
    pooled = jnp.mean(x_ref[...][0], axis=0, keepdims=True)          # (1, C)
    h = jnp.dot(pooled.astype(jnp.bfloat16), w1_ref[...],
                preferred_element_type=jnp.float32) + b1_ref[...]
    h = h * jax.nn.sigmoid(h)                                        # SiLU
    g = jnp.dot(h.astype(jnp.bfloat16), w2_ref[...],
                preferred_element_type=jnp.float32) + b2_ref[...]
    g_ref[...] = jax.nn.sigmoid(g)


def se_gate(x, se_p):
    """x: (N, H, W, C) -> per-(batch, channel) sigmoid gate (N, C)."""
    N, H, W, C = x.shape
    HW = H * W
    R = se_p["w1"].shape[-1]
    Rp = _round_up(R, 128)

    w1 = jnp.pad(se_p["w1"], ((0, 0), (0, Rp - R))).astype(jnp.bfloat16)
    b1 = jnp.pad(se_p["b1"].astype(jnp.float32), (0, Rp - R)).reshape(1, Rp)
    w2 = jnp.pad(se_p["w2"], ((0, Rp - R), (0, 0))).astype(jnp.bfloat16)
    b2 = se_p["b2"].astype(jnp.float32).reshape(1, C)
    xr = x.reshape(N, HW, C).astype(jnp.float32)

    return pl.pallas_call(
        _se_kernel,
        out_shape=jax.ShapeDtypeStruct((N, C), jnp.float32),
        grid=(N,),
        in_specs=[pl.BlockSpec((1, HW, C), lambda b: (b, 0, 0)),
                  pl.BlockSpec((C, Rp), lambda b: (0, 0)),
                  pl.BlockSpec((1, Rp), lambda b: (0, 0)),
                  pl.BlockSpec((Rp, C), lambda b: (0, 0)),
                  pl.BlockSpec((1, C), lambda b: (0, 0))],
        out_specs=pl.BlockSpec((1, C), lambda b: (b, 0)),
        compiler_params=pltpu.CompilerParams(
            dimension_semantics=("parallel",)),
    )(xr, w1, b1, w2, b2)


# ----------------------------------------------------------------------------
# Fused SE-gate * pointwise-projection conv (+BN affine) (+residual) kernel
# ----------------------------------------------------------------------------

def _pw_kernel(x_ref, g_ref, w_ref, sc_ref, sh_ref, *rest, has_residual):
    if has_residual:
        r_ref, o_ref = rest
    else:
        (o_ref,) = rest
    # x: (1, HW, Cin) f32, gate: (1, Cin) f32, w: (Cin, Coutp) bf16
    xg = (x_ref[...][0] * g_ref[...]).astype(jnp.bfloat16)          # (HW, Cin)
    y = jnp.dot(xg, w_ref[...], preferred_element_type=jnp.float32)
    y = y * sc_ref[...] + sh_ref[...]
    if has_residual:
        y = y + r_ref[...][0]
    o_ref[...] = y[None, :, :]


def pw_project_fused(x, gate, w, scale, shift, residual):
    """out = BN(( x * gate ) @ w) (+ residual);   x:(N,H,W,Cin), w:(Cin,Cout)."""
    N, H, W, Cin = x.shape
    Cout = w.shape[-1]
    Coutp = _round_up(Cout, 128)
    HW = H * W

    xr = x.reshape(N, HW, Cin).astype(jnp.float32)
    gr = gate.astype(jnp.float32)
    wp = jnp.pad(w, ((0, 0), (0, Coutp - Cout))).astype(jnp.bfloat16)
    sc = jnp.pad(scale.astype(jnp.float32), (0, Coutp - Cout)).reshape(1, Coutp)
    sh = jnp.pad(shift.astype(jnp.float32), (0, Coutp - Cout)).reshape(1, Coutp)

    has_res = residual is not None
    args = [xr, gr, wp, sc, sh]
    in_specs = [
        pl.BlockSpec((1, HW, Cin), lambda b: (b, 0, 0)),
        pl.BlockSpec((1, Cin), lambda b: (b, 0)),
        pl.BlockSpec((Cin, Coutp), lambda b: (0, 0)),
        pl.BlockSpec((1, Coutp), lambda b: (0, 0)),
        pl.BlockSpec((1, Coutp), lambda b: (0, 0)),
    ]
    if has_res:
        rr = jnp.pad(residual.reshape(N, HW, Cout).astype(jnp.float32),
                     ((0, 0), (0, 0), (0, Coutp - Cout)))
        args.append(rr)
        in_specs.append(pl.BlockSpec((1, HW, Coutp), lambda b: (b, 0, 0)))

    out = pl.pallas_call(
        partial(_pw_kernel, has_residual=has_res),
        out_shape=jax.ShapeDtypeStruct((N, HW, Coutp), jnp.float32),
        grid=(N,),
        in_specs=in_specs,
        out_specs=pl.BlockSpec((1, HW, Coutp), lambda b: (b, 0, 0)),
        compiler_params=pltpu.CompilerParams(
            dimension_semantics=("parallel",)),
    )(*args)
    return out[:, :, :Cout].reshape(N, H, W, Cout)


# ----------------------------------------------------------------------------
# Fused final pool + classifier kernel
# ----------------------------------------------------------------------------

def _classifier_kernel(x_ref, w_ref, b_ref, o_ref):
    pooled = jnp.mean(x_ref[...][0], axis=0, keepdims=True)          # (1, C)
    y = jnp.dot(pooled.astype(jnp.bfloat16), w_ref[...],
                preferred_element_type=jnp.float32) + b_ref[...]
    o_ref[...] = y


def classifier_fused(x, w, b):
    """AdaptiveAvgPool2d(1) + (Dropout: eval identity) + Linear."""
    N, H, W, C = x.shape
    ncls = w.shape[-1]
    Np = _round_up(ncls, 128)
    HW = H * W
    xr = x.reshape(N, HW, C).astype(jnp.float32)
    wp = jnp.pad(w, ((0, 0), (0, Np - ncls))).astype(jnp.bfloat16)
    bp = jnp.pad(b.astype(jnp.float32), (0, Np - ncls)).reshape(1, Np)

    out = pl.pallas_call(
        _classifier_kernel,
        out_shape=jax.ShapeDtypeStruct((N, Np), jnp.float32),
        grid=(N,),
        in_specs=[pl.BlockSpec((1, HW, C), lambda b_: (b_, 0, 0)),
                  pl.BlockSpec((C, Np), lambda b_: (0, 0)),
                  pl.BlockSpec((1, Np), lambda b_: (0, 0))],
        out_specs=pl.BlockSpec((1, Np), lambda b_: (b_, 0)),
        compiler_params=pltpu.CompilerParams(
            dimension_semantics=("parallel",)),
    )(xr, wp, bp)
    return out[:, :ncls]


# ----------------------------------------------------------------------------
# Dense conv = im2col (glue) + Pallas matmul
# ----------------------------------------------------------------------------

def conv2d_full(x, w, bias=None, scale=None, shift=None, act="none",
                kh=1, kw=1, sh=1, sw=1, ph=0, pw=0):
    """General (groups=1) conv in NHWC. w: (kh, kw, Cin, Cout)."""
    N, H, W, Cin = x.shape
    Cout = w.shape[-1]
    Ho = (H + 2 * ph - kh) // sh + 1
    Wo = (W + 2 * pw - kw) // sw + 1
    if kh == 1 and kw == 1 and sh == 1 and sw == 1 and ph == 0 and pw == 0:
        patches = x.reshape(N * H * W, Cin)
    else:
        xp = jnp.pad(x, ((0, 0), (ph, ph), (pw, pw), (0, 0)))
        cols = []
        for i in range(kh):
            for j in range(kw):
                cols.append(xp[:, i:i + (Ho - 1) * sh + 1:sh,
                               j:j + (Wo - 1) * sw + 1:sw, :])
        patches = jnp.stack(cols, axis=3).reshape(N * Ho * Wo, kh * kw * Cin)
    wmat = w.reshape(kh * kw * Cin, Cout)
    out = matmul_fused(patches, wmat, bias=bias, scale=scale, shift=shift,
                       act=act)
    return out.reshape(N, Ho, Wo, Cout)


# ----------------------------------------------------------------------------
# Model blocks (mirroring the PyTorch module structure)
# ----------------------------------------------------------------------------

def conv_bn_act(x, p, kernel_size, stride, padding, bn=True, act=True):
    """ConvBnAct: conv(no bias) -> (BN if out spatial > 1) -> SiLU."""
    N, H, W, _ = x.shape
    Ho = (H + 2 * padding - kernel_size) // stride + 1
    Wo = (W + 2 * padding - kernel_size) // stride + 1
    apply_bn = bn and (Ho > 1 and Wo > 1)       # ConvBnAct's spatial check
    scale, shift = (p["bn"] if apply_bn else (None, None))
    return conv2d_full(x, p["w"], bias=None, scale=scale, shift=shift,
                       act="silu" if act else "none",
                       kh=kernel_size, kw=kernel_size, sh=stride, sw=stride,
                       ph=padding, pw=padding)


def mbconv_forward(x, p):
    cfg = p["cfg"]
    k, s, pad = cfg["k"], cfg["stride"], cfg["pad"]
    residual = x

    # expand (Identity when expansion_factor == 1)
    if p["expand"] is not None:
        x = conv_bn_act(x, p["expand"], kernel_size=1, stride=1, padding=0)

    # depthwise ConvBnAct (groups = channels)
    N, H, W, C = x.shape
    Ho = (H + 2 * pad - k) // s + 1
    Wo = (W + 2 * pad - k) // s + 1
    if Ho > 1 and Wo > 1:
        dw_scale, dw_shift = p["dw"]["bn"]
    else:
        dw_scale = jnp.ones((C,), jnp.float32)
        dw_shift = jnp.zeros((C,), jnp.float32)
    x = depthwise_conv_bn_act(x, p["dw"]["w"], dw_scale, dw_shift, s, pad)

    # conv1k: Conv2d(C, C, (1,k), stride=(1,s), padding=(0,pad), bias=True)
    x = conv2d_full(x, p["conv1k_w"], bias=p["conv1k_b"], act="none",
                    kh=1, kw=k, sh=1, sw=s, ph=0, pw=pad)
    # convk1: Conv2d(C, C, (k,1), stride=(s,1), padding=(pad,0), bias=True)
    x = conv2d_full(x, p["convk1_w"], bias=p["convk1_b"], act="none",
                    kh=k, kw=1, sh=s, sw=1, ph=pad, pw=0)

    # Squeeze-Excitation gate (fused pool + 2 matmuls + activations)
    gate = se_gate(x, p["se"])                                      # (N, C)

    # Fused: (x * gate) -> pointwise projection -> BN affine -> (+ residual)
    Nb, Hc, Wc, Cc = x.shape
    n_out = p["pw"]["w"].shape[-1]
    if Hc > 1 and Wc > 1:
        pw_scale, pw_shift = p["pw"]["bn"]
    else:
        pw_scale = jnp.ones((n_out,), jnp.float32)
        pw_shift = jnp.zeros((n_out,), jnp.float32)
    # StochasticDepth is identity in eval mode.
    x = pw_project_fused(x, gate, p["pw"]["w"].reshape(Cc, n_out),
                         pw_scale, pw_shift,
                         residual if cfg["skip"] else None)
    return x


def efficientnet_forward(params, x_nchw):
    # layout: NCHW (PyTorch input) -> NHWC for all kernels
    x = jnp.transpose(x_nchw, (0, 2, 3, 1)).astype(jnp.float32)
    x = conv_bn_act(x, params["stem"], kernel_size=3, stride=2, padding=1)
    for bp in params["blocks"]:
        x = mbconv_forward(x, bp)
    x = conv_bn_act(x, params["head"], kernel_size=1, stride=1, padding=0)
    # AdaptiveAvgPool2d(1) + Dropout(eval identity) + Linear, fused
    logits = classifier_fused(x, params["fc_w"], params["fc_b"])
    return logits


# ----------------------------------------------------------------------------
# Deterministic parameter initialization
# ----------------------------------------------------------------------------

class ParamGen:
    def __init__(self, seed=0):
        self._key = jax.random.PRNGKey(seed)

    def _next(self):
        self._key, k = jax.random.split(self._key)
        return k

    def conv(self, kh, kw, cin, cout):
        std = 1.0 / math.sqrt(kh * kw * cin)
        return std * jax.random.normal(self._next(), (kh, kw, cin, cout),
                                       jnp.float32)

    def dwconv(self, k, c):
        std = 1.0 / math.sqrt(k * k)
        return std * jax.random.normal(self._next(), (k, k, c), jnp.float32)

    def bias(self, c):
        return 0.01 * jax.random.normal(self._next(), (c,), jnp.float32)

    def linear(self, cin, cout):
        std = 1.0 / math.sqrt(cin)
        return std * jax.random.normal(self._next(), (cin, cout), jnp.float32)

    def bn(self, c, eps=1e-5):
        # eval-mode BatchNorm folded into per-channel (scale, shift)
        gamma = 1.0 + 0.1 * jax.random.normal(self._next(), (c,), jnp.float32)
        beta = 0.05 * jax.random.normal(self._next(), (c,), jnp.float32)
        mean = 0.05 * jax.random.normal(self._next(), (c,), jnp.float32)
        var = 1.0 + 0.1 * jax.random.uniform(self._next(), (c,), jnp.float32)
        scale = gamma / jnp.sqrt(var + eps)
        shift = beta - mean * scale
        return (scale, shift)


def init_mbconv(gen, n_in, n_out, k, stride, expansion, reduction=4):
    inter = int(n_in * expansion)
    pad = (k - 1) // 2
    red = int(n_in // reduction)
    p = {"cfg": dict(k=k, stride=stride, pad=pad,
                     skip=(stride == 1 and n_in == n_out))}
    p["expand"] = (None if expansion == 1 else
                   {"w": gen.conv(1, 1, n_in, inter), "bn": gen.bn(inter)})
    p["dw"] = {"w": gen.dwconv(k, inter), "bn": gen.bn(inter)}
    p["conv1k_w"] = gen.conv(1, k, inter, inter)
    p["conv1k_b"] = gen.bias(inter)
    p["convk1_w"] = gen.conv(k, 1, inter, inter)
    p["convk1_b"] = gen.bias(inter)
    p["se"] = {"w1": gen.conv(1, 1, inter, red).reshape(inter, red),
               "b1": gen.bias(red),
               "w2": gen.conv(1, 1, red, inter).reshape(red, inter),
               "b2": gen.bias(inter)}
    p["pw"] = {"w": gen.conv(1, 1, inter, n_out), "bn": gen.bn(n_out)}
    return p


def init_params(gen, width_mult=1, depth_mult=1, num_classes=16):
    last_channel = ceil(1280 * width_mult)
    channels = 4 * ceil(int(32 * width_mult) / 4)
    params = {"stem": {"w": gen.conv(3, 3, 3, channels),
                       "bn": gen.bn(channels)}}

    in_channels = channels
    kernels = [5, 3, 5, 7, 5, 7, 3]
    expansions = [1, 6, 6, 6, 6, 6, 6]
    num_channels = [16, 24, 40, 80, 112, 192, 320]
    num_layers = [1, 2, 2, 3, 3, 4, 1]
    strides = [1, 2, 2, 2, 1, 2, 1]
    scaled_c = [4 * ceil(int(c * width_mult) / 4) for c in num_channels]
    scaled_l = [int(d * depth_mult) for d in num_layers]

    blocks = []
    for i in range(len(scaled_c)):
        for repeat in range(scaled_l[i]):
            n_in = in_channels if repeat == 0 else scaled_c[i]
            stride = strides[i] if repeat == 0 else 1
            blocks.append(init_mbconv(gen, n_in, scaled_c[i], kernels[i],
                                      stride, expansions[i]))
        in_channels = scaled_c[i]
    params["blocks"] = blocks
    params["head"] = {"w": gen.conv(1, 1, in_channels, last_channel),
                      "bn": gen.bn(last_channel)}
    params["fc_w"] = gen.linear(last_channel, num_classes)
    params["fc_b"] = gen.bias(num_classes)
    return params


# ----------------------------------------------------------------------------
# Main
# ----------------------------------------------------------------------------

if __name__ == "__main__":
    NUM_CLASSES = 16
    key = jax.random.PRNGKey(0)
    k_in, _ = jax.random.split(key)
    # NCHW input, PyTorch convention (3 input channels required by the stem).
    x = jax.random.normal(k_in, (2, 3, 32, 32), jnp.float32)

    gen = ParamGen(seed=1)
    params = init_params(gen, width_mult=1, depth_mult=1,
                         num_classes=NUM_CLASSES)

    logits = efficientnet_forward(params, x)
    logits = jax.block_until_ready(logits)

    assert logits.shape == (2, NUM_CLASSES), logits.shape
    assert bool(jnp.all(jnp.isfinite(logits)))
    print("KERNEL_OK")
</pallas_src>

<mosaic_0001>
module attributes {stable_mosaic.version = 11 : i64} {
  func.func @_matmul_kernel(%arg0: i32, %arg1: i32, %arg2: memref<256x128xbf16, #tpu.memory_space<vmem>>, %arg3: memref<128x128xbf16, #tpu.memory_space<vmem>>, %arg4: memref<1x128xf32, #tpu.memory_space<vmem>>, %arg5: memref<1x128xf32, #tpu.memory_space<vmem>>, %arg6: memref<1x128xf32, #tpu.memory_space<vmem>>, %arg7: memref<256x128xf32, #tpu.memory_space<vmem>>) attributes {dimension_semantics = [#tpu.dimension_semantics<parallel>, #tpu.dimension_semantics<arbitrary>], iteration_bounds = array<i64: 2, 1>, scalar_prefetch = 0 : i64, scratch_operands = 0 : i64, tpu.core_type = #tpu.core_type<tc>, window_params = [{transform_indices = @transform_0, window_bounds = array<i64: 256, 128>}, {transform_indices = @transform_1, window_bounds = array<i64: 128, 128>}, {pipeline_mode = #tpu.pipeline_mode<synchronous>, transform_indices = @transform_2, window_bounds = array<i64: 1, 128>}, {pipeline_mode = #tpu.pipeline_mode<synchronous>, transform_indices = @transform_3, window_bounds = array<i64: 1, 128>}, {pipeline_mode = #tpu.pipeline_mode<synchronous>, transform_indices = @transform_4, window_bounds = array<i64: 1, 128>}, {transform_indices = @transform_5, window_bounds = array<i64: 256, 128>}]} {
    %c0_i32 = arith.constant 0 : i32
    %0 = arith.cmpi eq, %arg1, %c0_i32 : i32
    %1 = arith.extui %0 : i1 to i32
    %c0_i32_0 = arith.constant 0 : i32
    %2 = arith.cmpi ne, %1, %c0_i32_0 : i32
    scf.if %2 {
      %cst_10 = arith.constant 0.000000e+00 : f32
      %12 = vector.broadcast %cst_10 : f32 to vector<256x128xf32>
      %c0_11 = arith.constant 0 : index
      %c0_12 = arith.constant 0 : index
      %13 = vector.load %arg7[%c0_11, %c0_12] : memref<256x128xf32, #tpu.memory_space<vmem>>, vector<256x128xf32>
      tpu.vector_store %arg7[%c0_11, %c0_12], %12 {strides = array<i32>} : memref<256x128xf32, #tpu.memory_space<vmem>>, vector<256x128xf32>,
    } else {
    }
    %c0 = arith.constant 0 : index
    %c0_1 = arith.constant 0 : index
    %3 = vector.load %arg7[%c0, %c0_1] : memref<256x128xf32, #tpu.memory_space<vmem>>, vector<256x128xf32>
    %c0_2 = arith.constant 0 : index
    %c0_3 = arith.constant 0 : index
    %4 = vector.load %arg2[%c0_2, %c0_3] : memref<256x128xbf16, #tpu.memory_space<vmem>>, vector<256x128xbf16>
    %c0_4 = arith.constant 0 : index
    %c0_5 = arith.constant 0 : index
    %5 = vector.load %arg3[%c0_4, %c0_5] : memref<128x128xbf16, #tpu.memory_space<vmem>>, vector<128x128xbf16>
    %cst = arith.constant dense<0.000000e+00> : vector<256x128xf32>
    %6 = tpu.matmul %4, %5, %cst {dimension_numbers = #tpu.dot_dimension_numbers<[1], [0], [0], [1], [0, 0, 1, 1], [], []>} : vector<256x128xbf16>, vector<128x128xbf16>, vector<256x128xf32> -> vector<256x128xf32>
    %7 = arith.addf %3, %6 : vector<256x128xf32>
    %c0_6 = arith.constant 0 : index
    %c0_7 = arith.constant 0 : index
    %8 = vector.load %arg7[%c0_6, %c0_7] : memref<256x128xf32, #tpu.memory_space<vmem>>, vector<256x128xf32>
    tpu.vector_store %arg7[%c0_6, %c0_7], %7 {strides = array<i32>} : memref<256x128xf32, #tpu.memory_space<vmem>>, vector<256x128xf32>,
    %c0_i32_8 = arith.constant 0 : i32
    %9 = arith.cmpi eq, %arg1, %c0_i32_8 : i32
    %10 = arith.extui %9 : i1 to i32
    %c0_i32_9 = arith.constant 0 : i32
    %11 = arith.cmpi ne, %10, %c0_i32_9 : i32
    scf.if %11 {
      %c0_10 = arith.constant 0 : index
      %c0_11 = arith.constant 0 : index
      %12 = vector.load %arg7[%c0_10, %c0_11] : memref<256x128xf32, #tpu.memory_space<vmem>>, vector<256x128xf32>
      %c0_12 = arith.constant 0 : index
      %c0_13 = arith.constant 0 : index
      %13 = vector.load %arg4[%c0_12, %c0_13] : memref<1x128xf32, #tpu.memory_space<vmem>>, vector<1x128xf32>
      %14 = vector.broadcast %13 : vector<1x128xf32> to vector<256x128xf32>
      %15 = arith.addf %12, %14 : vector<256x128xf32>
      %c0_14 = arith.constant 0 : index
      %c0_15 = arith.constant 0 : index
      %16 = vector.load %arg5[%c0_14, %c0_15] : memref<1x128xf32, #tpu.memory_space<vmem>>, vector<1x128xf32>
      %17 = vector.broadcast %16 : vector<1x128xf32> to vector<256x128xf32>
      %18 = arith.mulf %15, %17 : vector<256x128xf32>
      %c0_16 = arith.constant 0 : index
      %c0_17 = arith.constant 0 : index
      %19 = vector.load %arg6[%c0_16, %c0_17] : memref<1x128xf32, #tpu.memory_space<vmem>>, vector<1x128xf32>
      %20 = vector.broadcast %19 : vector<1x128xf32> to vector<256x128xf32>
      %21 = arith.addf %18, %20 : vector<256x128xf32>
      %22 = arith.negf %21 : vector<256x128xf32>
      %23 = math.exp %22 : vector<256x128xf32>
      %cst_18 = arith.constant 1.000000e+00 : f32
      %24 = vector.broadcast %cst_18 : f32 to vector<256x128xf32>
      %25 = arith.addf %24, %23 : vector<256x128xf32>
      %26 = arith.divf %24, %25 : vector<256x128xf32>
      %27 = arith.mulf %21, %26 : vector<256x128xf32>
      %c0_19 = arith.constant 0 : index
      %c0_20 = arith.constant 0 : index
      %28 = vector.load %arg7[%c0_19, %c0_20] : memref<256x128xf32, #tpu.memory_space<vmem>>, vector<256x128xf32>
      tpu.vector_store %arg7[%c0_19, %c0_20], %27 {strides = array<i32>} : memref<256x128xf32, #tpu.memory_space<vmem>>, vector<256x128xf32>,
    } else {
    }
    return
  }
  func.func @transform_0(%arg0: i32, %arg1: i32) -> (i32, i32) {
    %c0_i32 = arith.constant 0 : i32
    return %arg0, %arg1 : i32, i32
  }
  func.func @transform_1(%arg0: i32, %arg1: i32) -> (i32, i32) {
    %c0_i32 = arith.constant 0 : i32
    %c0_i32_0 = arith.constant 0 : i32
    return %arg1, %c0_i32 : i32, i32
  }
  func.func @transform_2(%arg0: i32, %arg1: i32) -> (i32, i32) {
    %c0_i32 = arith.constant 0 : i32
    %c0_i32_0 = arith.constant 0 : i32
    %c0_i32_1 = arith.constant 0 : i32
    return %c0_i32, %c0_i32_0 : i32, i32
  }
  func.func @transform_3(%arg0: i32, %arg1: i32) -> (i32, i32) {
    %c0_i32 = arith.constant 0 : i32
    %c0_i32_0 = arith.constant 0 : i32
    %c0_i32_1 = arith.constant 0 : i32
    return %c0_i32, %c0_i32_0 : i32, i32
  }
  func.func @transform_4(%arg0: i32, %arg1: i32) -> (i32, i32) {
    %c0_i32 = arith.constant 0 : i32
    %c0_i32_0 = arith.constant 0 : i32
    %c0_i32_1 = arith.constant 0 : i32
    return %c0_i32, %c0_i32_0 : i32, i32
  }
  func.func @transform_5(%arg0: i32, %arg1: i32) -> (i32, i32) {
    %c0_i32 = arith.constant 0 : i32
    %c0_i32_0 = arith.constant 0 : i32
    return %arg0, %c0_i32 : i32, i32
  }
}

</mosaic_0001>

<bundles_post_ra>
// kernel: tpu_custom_call.1
= control target key start
LH: loop header
LB: loop body
LE: loop exit
PB: predicated region body
PF: predicated region fallthrough
CT: control target
= control target key end

     0   :  { %10 = vsyncpa [#allocation3], 0  ;;  %s2429_s0 = inlined_call_operand.hbm [shape: bf16[512,128], index: 0, kind: input, shape index: {}]   ;;  %s2430_s1 = inlined_call_operand.hbm [shape: bf16[128,128], index: 1, kind: input, shape index: {}]   ;;  %s2431_s2 = inlined_call_operand.vmem [shape: f32[1,128], index: 2, kind: input, shape index: {}]   ;;  %s2432_s3 = inlined_call_operand.vmem [shape: f32[1,128], index: 3, kind: input, shape index: {}]   ;;  %s2433_s4 = inlined_call_operand.vmem [shape: f32[1,128], index: 4, kind: input, shape index: {}]   ;;  %s2434_s5 = inlined_call_operand.hbm [shape: f32[512,128], index: 5, kind: output, shape index: {}]  }
   0x1   :  { %12 = vsyncpa [#allocation3 + $0x1], 0 }
   0x2   :  { %13 = vsyncpa [#allocation6], 0 }
   0x3   :  { %14 = vsyncpa [#allocation4], 0 }
   0x4   :  { %16 = vsyncpa [#allocation4 + $0x1], 0  ;;  %s1866_s18 = smov 0   ;;  %s1868_s19 = smov 0  }
   0x5   :  { %s1870_s20 = smov 0   ;;  %s1872_s21 = smov 0  }
   0x6   :  { %s1874_s22 = smov 0   ;;  %s1876_s23 = smov 0  }
   0x7 LB: > { %s1287_s24 = sadd.s32 4294967295, %s1827_s23   ;;  %s1288_s25 = sadd.s32 4294967294, %s1827_s23   ;;  %s1827_s23 = sphi %s1876_s23, %s22_s23   ;;  %s1823_s22 = sphi %s1874_s22, %s2460_s22   ;;  %s1819_s21 = sphi %s1872_s21, %s2459_s21   ;;  %s1815_s20 = sphi %s1870_s20, %s2458_s20   ;;  %s1811_s19 = sphi %s1868_s19, %s2457_s19   ;;  %s1807_s18 = sphi %s1866_s18, %s2456_s18  }
   0x8   : > { %p56_p0 = scmp.ne.s32.totalorder %s1811_s19, %s1807_s18  ;;  %p1900_p1 = scmp.eq.s32.totalorder %s1287_s24, 0 }
   0x9   : > { %p1904_p2 = scmp.eq.s32.totalorder %s1287_s24, 1  ;;  %p175_p3 = scmp.eq.s32.totalorder %s1288_s25, 1 }
   0xa   : > { %s2440_s26 = scalar_select %p1900_p1, 1, 0 }
   0xb   : > { %s2441_s27 = scalar_select %p1904_p2, 1, 0 }
   0xc   : > { %p1910_p4 = por %p1900_p1, %p56_p0  ;;  %p1289_p5 = scmp.ge.s32.totalorder %s1827_s23, 1 }
   0xd   : > { %p1915_p6 = por %p175_p3, %p56_p0  ;;  %p182_p7 = scmp.lt.s32.totalorder %s1827_s23, 3 }
   0xe   : > { %s2442_s28 = scalar_select %p1910_p4, 1, 0 }
   0xf   : > { %s2443_s29 = scalar_select %p1915_p6, 1, 0 }
  0x10   : > { %p1920_p8 = pnand %p1289_p5, %p182_p7  ;;  %s1829_s6 = smov [#allocation5]  }
  0x11   : > { %s197_s7 = sshll.u32 %s1829_s6, 4  ;;  %s34_s9 = sadd.s32 1, %s1823_s22  ;;  %s198_s7 = int_to_ptr.vmem [resolvable:$true] %s197_s7 }
  0x12   : > { %s2444_s30 = scalar_select %p1920_p8, 1, 0 }
  0x13   : > { %p1461_p9 = pneg %p1920_p8  ;;  %s1683_s12 = scalar_lea.hbm %s2430_s1, 1024 }
  0x14   : > { %p1684_p12 = scmp.ne.s32.totalorder %s2430_s1, %s1683_s12  ;;  %p1690_p5 = scmp.lt.u32.totalorder %s1683_s12, %s2430_s1 }
  0x15   : > { %p1929_p11 = pnand %p1461_p9, %p1900_p1 }
  0x17   : > { %p1685_p13 = pneg %p1929_p11 }
  0x19   : > { %p1686_p0 = pnand %p1685_p13, %p1684_p12 }
  0x1b   : > { %p1687_p3 = pneg %p1686_p0 }
  0x1d   : > { %p1692_p7 = pnand %p1690_p5, %p1687_p3 }
  0x1f   : > { %1695 = shalt.err (!%p1692_p7)
}
  0x20   : > { %s1696_s17 = scalar_lea.vmem %s198_s7, 1024  ;;  %p1704_p1 = scmp.lt.s32.totalorder %s198_s7, %s198_s7 }
  0x21   : > { %p1697_p9 = scmp.ne.s32.totalorder %s198_s7, %s1696_s17  ;;  %p1705_p4 = scmp.lt.s32.totalorder %s1696_s17, %s1696_s17 }
  0x23   : > { %p1699_p10 = pnand %p1697_p9, %p1685_p13  ;;  %p1706_p8 = por %p1705_p4, %p1704_p1 }
  0x25   : > { %p1700_p6 = pneg %p1699_p10 }
  0x27   : > { %p1707_p2 = pnand %p1706_p8, %p1700_p6 }
  0x29   : > { %1710 = shalt.err (!%p1707_p2)
}
  0x2a   : > { %s2439_s24 = smov 64   ;;  %s1831_s25 = smov 4  }
  0x2b   : > { %1464 = dma.hbm_to_vmem [thread:$0]  (!%p1929_p11), %s2430_s1, 1024, %s198_s7, [#allocation6], %s2439_s24, %s2439_s24, %s1831_s25  }
  0x2c   : > { %p36_p1 = scmp.ge.s32.totalorder %s34_s9, 2  ;;  %s43_s11 = sadd.s32 1, %s1815_s20 }
  0x2d   : > { %p50_p2 = scmp.ne.s32.totalorder %s1815_s20, %s1811_s19  ;;  %p51_p4 = scmp.eq.s32.totalorder %s1827_s23, 0 }
  0x2e   : > { %s2462_s9 = smov (%p36_p1, %s34_s9), 0  ;;  %p2447_p8 = scmp.ne.s32.totalorder %s2441_s27, 0 }
  0x2f   : > { %p1959_p6 = por %p51_p4, %p50_p2  ;;  %s38_s13 = ssub.s32 %s1823_s22, %s2462_s9 }
  0x30   : > { %p1965_p10 = por %p2447_p8, %p50_p2  ;;  %p1474_p12 = scmp.lt.s32.totalorder %s1827_s23, 2 }
  0x31   : > { %p41_p11 = scmp.eq.s32.totalorder %s38_s13, 0  ;;  %s220_s7 = sand.u32 1, %s1815_s20  }
  0x32   : > { %s1292_s14 = sshll.u32 %s220_s7, 7  ;;  %s1363_s16 = sshll.u32 %s1823_s22, 11 }
  0x33   : > { %s1974_s15 = scalar_select %p41_p11, %s1815_s20, %s43_s11  }
  0x34   : > { %s1980_s10 = scalar_lea.hbm %s2429_s0, %s1363_s16  ;;  %s224_s27 = scalar_lea.vmem [#allocation2], %s1292_s14 }
  0x35   : > { %s232_s24 = sshll.u32 %s224_s27, 4  ;;  %p1986_p13 = pnand %p1474_p12, %p1959_p6  ;;  %s1982_s24 = int_to_ptr.vmem [resolvable:$true] %s232_s24 }
  0x36   : > { %s1990_s11 = scalar_lea.sflag [#allocation3], %s220_s7  ;;  %s1711_s17 = scalar_lea.hbm %s1980_s10, 2048 }
  0x37   : > { %p1712_p0 = scmp.ne.s32.totalorder %s1980_s10, %s1711_s17  ;;  %p1713_p3 = pneg %p1986_p13 }
  0x38   : > { %s1716_s12 = scalar_lea.hbm %s2429_s0, 4096  ;;  %p1717_p9 = scmp.lt.u32.totalorder %s1980_s10, %s2429_s0 }
  0x39   : > { %p1714_p5 = pnand %p1713_p3, %p1712_p0  ;;  %p1718_p1 = scmp.lt.u32.totalorder %s1716_s12, %s1711_s17 }
  0x3a   : > { %p1720_p4 = scmp.lt.u32.totalorder %s1711_s17, %s1980_s10 }
  0x3b   : > { %p1715_p7 = pneg %p1714_p5  ;;  %p1719_p2 = por %p1718_p1, %p1717_p9 }
  0x3d   : > { %p1721_p6 = por %p1720_p4, %p1719_p2 }
  0x3f   : > { %p1722_p8 = pnand %p1721_p6, %p1715_p7 }
  0x41   : > { %1725 = shalt.err (!%p1722_p8)
}
  0x42   : > { %s1726_s7 = scalar_lea.vmem %s1982_s24, 2048  ;;  %s1832_s14 = smov [#allocation2]  }
  0x43   : > { %p1727_p12 = scmp.ne.s32.totalorder %s1982_s24, %s1726_s7  ;;  %s1731_s16 = sshll.u32 %s1832_s14, 4  ;;  %s1732_s16 = int_to_ptr.vmem [resolvable:$false] %s1731_s16 }
  0x44   : > { %s1733_s6 = scalar_lea.vmem %s1732_s16, 4096  ;;  %p1734_p5 = scmp.lt.s32.totalorder %s1982_s24, %s1732_s16 }
  0x45   : > { %p1729_p11 = pnand %p1727_p12, %p1713_p3  ;;  %p1735_p9 = scmp.lt.s32.totalorder %s1733_s6, %s1726_s7 }
  0x47   : > { %p1730_p0 = pneg %p1729_p11  ;;  %p1736_p1 = por %p1735_p9, %p1734_p5 }
  0x49   : > { %p1737_p2 = pnand %p1736_p1, %p1730_p0 }
  0x4b   : > { %1740 = shalt.err (!%p1737_p2)
}
  0x4c   : > { %s2450_s17 = smov 64   ;;  %p2451_p3 = scmp.ne.s32.totalorder %s2444_s30, 0 }
  0x4d   : > { %1468 = dma.hbm_to_vmem [thread:$0]  (!%p1986_p13), %s1980_s10, 2048, %s1982_s24, %s1990_s11, %s2450_s17, %s2450_s17, %s1831_s25  }
  0x4e   : > { %244 = sbr.rel (%p2451_p3) target bundleno = 443 (0x1bb), region = 40  ;;  %s2024_s12 = sand.u32 (!%p2451_p3), 1, %s1811_s19  }
  0x4f   : > { %s1296_s27 = sshll.u32 (!%p2451_p3), %s2024_s12, 7  ;;  %s247_s7 = scalar_lea.sflag (!%p2451_p3), [#allocation3], %s2024_s12 }
  0x50   : > { %s2028_s14 = scalar_lea.vmem (!%p2451_p3), [#allocation2], %s1296_s27  ;;  %p2452_p7 = scmp.ne.s32.totalorder (!%p2451_p3), %s2442_s28, 0 }
  0x55   : > { %1794 = dma.done.wait (%p2452_p7), %s247_s7, 2048  }
  0x56   : > { %1796 = vsyncadd (%p2452_p7), %s247_s7, 4294965248  ;;  %p2453_p13 = scmp.ne.s32.totalorder %s2440_s26, 0 }
  0x58   : > { %1798 = dma.done.wait (%p2453_p13), [#allocation6], 1024  }
  0x59   : > { %1800 = vsyncadd (%p2453_p13), [#allocation6], 4294966272  ;;  %v1531_v0 = vld [vmem:[#allocation5] sm:$0xff]   ;;  %v1532_v1 = vld [vmem:[#allocation5 + $0x8] sm:$0xff]   ;;  %s1298_s13 = sshll.u32 %s2024_s12, 8  ;;  %s1364_s16 = sshll.u32 %s1819_s21, 12 }
  0x5a   : > { %1389 = vmatprep.subr.bf16.mxu0 %v1531_v0  ;;  %1437 = vmatprep.subr.bf16.mxu1 %v1531_v0  ;;  %v1533_v2 = vld [vmem:[#allocation5 + $0x10] sm:$0xff]   ;;  %v1534_v3 = vld [vmem:[#allocation5 + $0x18] sm:$0xff]   ;;  %v1539_v4 = vld [vmem:[%s2028_s14] sm:$0xff]   ;;  %s2225_s11 = scalar_lea.vmem [#allocation7], %s1298_s13  ;;  %s2375_s7 = scalar_lea.hbm %s2434_s5, %s1364_s16 }
  0x5b   : > { %1390 = vmatpush3.bf16.msra.mxu0 %v1531_v0  ;;  %1445 = vmatpush3.bf16.msra.mxu1 %v1531_v0  ;;  %v1540_v5 = vld [vmem:[%s2028_s14 + $0x40] sm:$0xff]   ;;  %v1536_v7 = vld [vmem:[#allocation5 + $0x28] sm:$0xff]   ;;  %v1537_v8 = vld [vmem:[#allocation5 + $0x30] sm:$0xff]   ;;  %s1192_s6 = sshll.u32 %s2225_s11, 4  ;;  %s1179_s21 = scalar_lea.sflag [#allocation4], %s2024_s12  ;;  %s2377_s6 = int_to_ptr.vmem [resolvable:$true] %s1192_s6 }
  0x5c   : > { %1391 = vmatprep.subr.bf16.mxu0 %v1532_v1  ;;  %1438 = vmatprep.subr.bf16.mxu1 %v1532_v1  ;;  %v1535_v6 = vld [vmem:[#allocation5 + $0x20] sm:$0xff]   ;;  %v1538_v9 = vld [vmem:[#allocation5 + $0x38] sm:$0xff]   ;;  %v1541_v10 = vld [vmem:[%s2028_s14 + $0x8] sm:$0xff]   ;;  %s1833_s26 = smov [#allocation7]  }
  0x5d   : > { %1405 = vmatprep.mubr.bf16.mxu0 %v1539_v4  ;;  %1421 = vmatprep.mubr.bf16.mxu1 %v1540_v5  ;;  %v1542_v11 = vld [vmem:[%s2028_s14 + $0x48] sm:$0xff]   ;;  %v1543_v12 = vld [vmem:[%s2028_s14 + $0x10] sm:$0xff]   ;;  %v1545_v14 = vld [vmem:[%s2028_s14 + $0x18] sm:$0xff]   ;;  %s1745_s28 = sshll.u32 %s1833_s26, 4  ;;  %s1746_s28 = int_to_ptr.vmem [resolvable:$false] %s1745_s28 }
  0x5e   : > { %v1544_v13 = vld [vmem:[%s2028_s14 + $0x50] sm:$0xff]   ;;  %v1546_v15 = vld [vmem:[%s2028_s14 + $0x58] sm:$0xff]   ;;  %v1547_v16 = vld [vmem:[%s2028_s14 + $0x20] sm:$0xff]   ;;  %s1747_s30 = scalar_lea.vmem %s1746_s28, 8192  ;;  %p1748_p12 = scmp.lt.s32.totalorder %s2377_s6, %s1746_s28 }
  0x5f   : > { %1392 = vmatpush3.bf16.msra.mxu0 %v1532_v1  ;;  %1446 = vmatpush3.bf16.msra.mxu1 %v1532_v1  ;;  %v1548_v17 = vld [vmem:[%s2028_s14 + $0x60] sm:$0xff]   ;;  %v1549_v18 = vld [vmem:[%s2028_s14 + $0x28] sm:$0xff]   ;;  %v1551_v20 = vld [vmem:[%s2028_s14 + $0x30] sm:$0xff]  }
  0x60   : > { %1393 = vmatprep.subr.bf16.mxu0 %v1533_v2  ;;  %1439 = vmatprep.subr.bf16.mxu1 %v1533_v2  ;;  %v1550_v19 = vld [vmem:[%s2028_s14 + $0x68] sm:$0xff]   ;;  %v1552_v21 = vld [vmem:[%s2028_s14 + $0x70] sm:$0xff]   ;;  %v1553_v22 = vld [vmem:[%s2028_s14 + $0x38] sm:$0xff]  }
  0x61   : > { %v1554_v23 = vld [vmem:[%s2028_s14 + $0x78] sm:$0xff]   ;;  %v2057_v25 = vld [vmem:[%s2431_s2] ss:$0 sm:$0xff]  ;;  %s1741_s14 = scalar_lea.vmem %s2377_s6, 4096 }
  0x62   : > { %v2062_v29 = vld [vmem:[%s2432_s3] ss:$0 sm:$0xff]  ;;  %p1742_p4 = scmp.ne.s32.totalorder %s2377_s6, %s1741_s14  ;;  %p1749_p11 = scmp.lt.s32.totalorder %s1747_s30, %s1741_s14 }
  0x63   : > { %1394 = vmatpush3.bf16.msra.mxu0 %v1533_v2  ;;  %1447 = vmatpush3.bf16.msra.mxu1 %v1533_v2  ;;  %v2069_v36 = vld [vmem:[%s2433_s4] ss:$0 sm:$0xff] }
  0x64   : > { %1395 = vmatprep.subr.bf16.mxu0 %v1534_v3  ;;  %1440 = vmatprep.subr.bf16.mxu1 %v1534_v3  ;;  %p1743_p6 = pnand %p1742_p4, %p1965_p10  ;;  %p1750_p0 = por %p1749_p11, %p1748_p12 }
  0x66   : > { %p1744_p8 = pneg %p1743_p6 }
  0x67   : > { %1396 = vmatpush3.bf16.msra.mxu0 %v1534_v3  ;;  %1448 = vmatpush3.bf16.msra.mxu1 %v1534_v3 }
  0x68   : > { %1397 = vmatprep.subr.bf16.mxu0 %v1535_v6  ;;  %1441 = vmatprep.subr.bf16.mxu1 %v1535_v6  ;;  %p1751_p5 = pnand %p1750_p0, %p1744_p8 }
  0x6b   : > { %1398 = vmatpush3.bf16.msra.mxu0 %v1535_v6  ;;  %1449 = vmatpush3.bf16.msra.mxu1 %v1535_v6 }
  0x6c   : > { %1399 = vmatprep.subr.bf16.mxu0 %v1536_v7  ;;  %1442 = vmatprep.subr.bf16.mxu1 %v1536_v7 }
  0x6f   : > { %1400 = vmatpush3.bf16.msra.mxu0 %v1536_v7  ;;  %1450 = vmatpush3.bf16.msra.mxu1 %v1536_v7 }
  0x70   : > { %1401 = vmatprep.subr.bf16.mxu0 %v1537_v8  ;;  %1443 = vmatprep.subr.bf16.mxu1 %v1537_v8 }
  0x73   : > { %1402 = vmatpush3.bf16.msra.mxu0 %v1537_v8  ;;  %1451 = vmatpush3.bf16.msra.mxu1 %v1537_v8 }
  0x74   : > { %1403 = vmatprep.subr.bf16.mxu0 %v1538_v9  ;;  %1444 = vmatprep.subr.bf16.mxu1 %v1538_v9 }
  0x77   : > { %1404 = vmatpush3.bf16.msra.mxu0 %v1538_v9  ;;  %1452 = vmatpush3.bf16.msra.mxu1 %v1538_v9 }
  0x7a   : > { %1406 = vmatmul.mubr.bf16.vlgmr.msra.gmra.mrb[0].mxu0 %v1541_v10  ;;  %1422 = vmatmul.mubr.bf16.vlgmr.msra.gmra.mrb[0].mxu1 %v1542_v11 }
  0x7b   : > { %1409 = vmatprep.mubr.bf16.mxu0 %v1543_v12  ;;  %1425 = vmatprep.mubr.bf16.mxu1 %v1544_v13 }
  0x82   : > { %1410 = vmatmul.mubr.bf16.gmra.mrb[4].mxu0 %v1545_v14  ;;  %1426 = vmatmul.mubr.bf16.gmra.mrb[4].mxu1 %v1546_v15 }
  0x83   : > { %1413 = vmatprep.mubr.bf16.mxu0 %v1547_v16  ;;  %1429 = vmatprep.mubr.bf16.mxu1 %v1548_v17 }
  0x8a   : > { %1414 = vmatmul.mubr.bf16.gmra.mrb[8].mxu0 %v1549_v18  ;;  %1430 = vmatmul.mubr.bf16.gmra.mrb[8].mxu1 %v1550_v19 }
  0x8b   : > { %1417 = vmatprep.mubr.bf16.mxu0 %v1551_v20  ;;  %1433 = vmatprep.mubr.bf16.mxu1 %v1552_v21 }
  0x92   : > { %1418 = vmatmul.mubr.bf16.gmra.mrb[12].mxu0 %v1553_v22  ;;  %1434 = vmatmul.mubr.bf16.gmra.mrb[12].mxu1 %v1554_v23 }
 0x14d   : > { %v1407_v24 = vpop.f32.mrb[0].mxu0  ;;  %v1423_v26 = vpop.f32.mrb[0].mxu1 }
 0x14e   : > { %v579_v27 = vpop.f32.mrb[1].mxu0  ;;  %v643_v28 = vpop.f32.mrb[1].mxu1  ;;  %v814_v32 = vadd.f32 %v1407_v24, %v2057_v25  ;;  %v830_v33 = vadd.f32 %v1423_v26, %v2057_v25 }
 0x14f   : > { %v1408_v30 = vpop.f32.mrb[2].mxu0  ;;  %v1424_v31 = vpop.f32.mrb[2].mxu1  ;;  %v812_v37 = vadd.f32 %v2057_v25, %v579_v27  ;;  %v828_v38 = vadd.f32 %v2057_v25, %v643_v28 }
 0x150   : > { %v582_v34 = vpop.f32.mrb[3].mxu0  ;;  %v646_v35 = vpop.f32.mrb[3].mxu1  ;;  %v853_v39 = vmul.f32 %v2062_v29, %v814_v32  ;;  %v869_v40 = vmul.f32 %v2062_v29, %v830_v33  ;;  %v815_v41 = vadd.f32 %v1408_v30, %v2057_v25  ;;  %v831_v42 = vadd.f32 %v1424_v31, %v2057_v25 }
 0x151   : > { %v851_v43 = vmul.f32 %v2062_v29, %v812_v37  ;;  %v867_v44 = vmul.f32 %v2062_v29, %v828_v38  ;;  %v813_v45 = vadd.f32 %v2057_v25, %v582_v34  ;;  %v829_v46 = vadd.f32 %v2057_v25, %v646_v35 }
 0x152   : > { %v2082_v47 = vadd.f32 %v2069_v36, %v853_v39  ;;  %v2085_v48 = vadd.f32 %v2069_v36, %v869_v40  ;;  %v854_v49 = vmul.f32 %v2062_v29, %v815_v41  ;;  %v870_v50 = vmul.f32 %v2062_v29, %v831_v42 }
 0x153   : > { %v2090_v51 = vadd.f32 %v2069_v36, %v851_v43  ;;  %v2093_v52 = vadd.f32 %v2069_v36, %v867_v44  ;;  %v852_v53 = vmul.f32 %v2062_v29, %v813_v45  ;;  %v868_v54 = vmul.f32 %v2062_v29, %v829_v46 }
 0x154   : > { %v1328_v57 = vmul.f32 -1.442695, %v2082_v47  ;;  %v1344_v58 = vmul.f32 -1.442695, %v2085_v48  ;;  %v2100_v59 = vadd.f32 %v2069_v36, %v854_v49  ;;  %v2103_v60 = vadd.f32 %v2069_v36, %v870_v50 }
 0x155   : > { %v1411_v55 = vpop.f32.mrb[4].mxu0  ;;  %v1427_v56 = vpop.f32.mrb[4].mxu1  ;;  %v1326_v63 = vmul.f32 -1.442695, %v2090_v51  ;;  %v1342_v0 = vmul.f32 -1.442695, %v2093_v52  ;;  %v2108_v1 = vadd.f32 %v2069_v36, %v852_v53  ;;  %v2111_v2 = vadd.f32 %v2069_v36, %v868_v54 }
 0x156   : > { %v595_v61 = vpop.f32.mrb[5].mxu0  ;;  %v659_v62 = vpop.f32.mrb[5].mxu1  ;;  %1555 = vpow2.f32 %v1328_v57  ;;  %v1329_v5 = vmul.f32 -1.442695, %v2100_v59  ;;  %v1345_v6 = vmul.f32 -1.442695, %v2103_v60  ;;  %v818_v11 = vadd.f32 %v1411_v55, %v2057_v25 }
 0x157   : > { %v1412_v3 = vpop.f32.mrb[6].mxu0  ;;  %v1428_v4 = vpop.f32.mrb[6].mxu1  ;;  %1557 = vpow2.f32 %v1344_v58  ;;  %v1327_v9 = vmul.f32 -1.442695, %v2108_v1  ;;  %v1343_v10 = vmul.f32 -1.442695, %v2111_v2  ;;  %v834_v12 = vadd.f32 %v1427_v56, %v2057_v25 }
 0x158   : > { %v598_v7 = vpop.f32.mrb[7].mxu0  ;;  %v662_v8 = vpop.f32.mrb[7].mxu1  ;;  %1559 = vpow2.f32 %v1326_v63  ;;  %v857_v13 = vmul.f32 %v2062_v29, %v818_v11  ;;  %v816_v14 = vadd.f32 %v2057_v25, %v595_v61  ;;  %v832_v15 = vadd.f32 %v2057_v25, %v659_v62 }
 0x159   : > { %1561 = vpow2.f32 %v1342_v0  ;;  %v873_v16 = vmul.f32 %v2062_v29, %v834_v12  ;;  %v819_v17 = vadd.f32 %v1412_v3, %v2057_v25  ;;  %v835_v18 = vadd.f32 %v1428_v4, %v2057_v25 }
 0x15a   : > { %1563 = vpow2.f32 %v1329_v5  ;;  %v2126_v21 = vadd.f32 %v2069_v36, %v857_v13  ;;  %v855_v22 = vmul.f32 %v2062_v29, %v816_v14  ;;  %v871_v23 = vmul.f32 %v2062_v29, %v832_v15 }
 0x15b   : > { %1565 = vpow2.f32 %v1345_v6  ;;  %v2135_v27 = vadd.f32 %v2069_v36, %v873_v16  ;;  %v858_v28 = vmul.f32 %v2062_v29, %v819_v17  ;;  %v874_v30 = vmul.f32 %v2062_v29, %v835_v18 }
 0x15c   : > { %1567 = vpow2.f32 %v1327_v9  ;;  %v1332_v33 = vmul.f32 -1.442695, %v2126_v21  ;;  %v2145_v34 = vadd.f32 %v2069_v36, %v855_v22  ;;  %v2148_v35 = vadd.f32 %v2069_v36, %v871_v23 }
 0x15d   : > { %v1415_v19 = vpop.f32.mrb[8].mxu0  ;;  %v1431_v20 = vpop.f32.mrb[8].mxu1  ;;  %1569 = vpow2.f32 %v1343_v10  ;;  %v1348_v39 = vmul.f32 -1.442695, %v2135_v27  ;;  %v2156_v40 = vadd.f32 %v2069_v36, %v858_v28  ;;  %v2159_v41 = vadd.f32 %v2069_v36, %v874_v30 }
 0x15e   : > { %v2130_v24 = vpop.f32.mrb[9].mxu0  ;;  %v2132_v26 = vpop.f32.mrb[9].mxu1  ;;  %1571 = vpow2.f32 %v1332_v33  ;;  %v1330_v43 = vmul.f32 -1.442695, %v2145_v34  ;;  %v1346_v44 = vmul.f32 -1.442695, %v2148_v35  ;;  %v817_v45 = vadd.f32 %v2057_v25, %v598_v7 }
 0x15f   : > { %v2139_v31 = vpop.f32.mrb[10].mxu0  ;;  %v2141_v32 = vpop.f32.mrb[10].mxu1  ;;  %1573 = vpow2.f32 %v1348_v39  ;;  %v1333_v50 = vmul.f32 -1.442695, %v2156_v40  ;;  %v2166_v53 = vmul.f32 -1.442695, %v2159_v41  ;;  %v833_v57 = vadd.f32 %v2057_v25, %v662_v8 }
 0x160   : > { %v2150_v37 = vpop.f32.mrb[11].mxu0  ;;  %v2152_v38 = vpop.f32.mrb[11].mxu1  ;;  %1575 = vpow2.f32 %v1330_v43  ;;  %v856_v56 = vmul.f32 %v2062_v29, %v817_v45  ;;  %v822_v10 = vadd.f32 %v1415_v19, %v2057_v25  ;;  %v838_v11 = vadd.f32 %v1431_v20, %v2057_v25 }
 0x161   : > { %v1556_v42 = vpop.eup %1555  ;;  %v872_v5 = vmul.f32 %v2062_v29, %v833_v57  ;;  %v820_v45 = vadd.f32 %v2057_v25, %v2130_v24  ;;  %v823_v24 = vadd.f32 %v2139_v31, %v2057_v25 }
 0x162   : > { %v1558_v46 = vpop.eup %1557  ;;  %v1020_v49 = vadd.f32 1.0, %v1556_v42  ;;  %v2175_v4 = vadd.f32 %v2069_v36, %v856_v56  ;;  %v861_v23 = vmul.f32 %v2062_v29, %v822_v10  ;;  %v877_v28 = vmul.f32 %v2062_v29, %v838_v11 }
 0x163   : > { %v1560_v54 = vpop.eup %1559  ;;  %v1036_v55 = vadd.f32 1.0, %v1558_v46  ;;  %v2190_v17 = vadd.f32 %v2069_v36, %v872_v5  ;;  %v862_v11 = vmul.f32 %v2062_v29, %v823_v24 }
 0x164   : > { %v1562_v58 = vpop.eup %1561  ;;  %1577 = vrcp.f32 %v1020_v49  ;;  %v1018_v61 = vadd.f32 1.0, %v1560_v54  ;;  %v1331_v16 = vmul.f32 -1.442695, %v2175_v4  ;;  %v2200_v39 = vadd.f32 %v2069_v36, %v861_v23 }
 0x165   : > { %v2170_v62 = vpop.f32.mrb[12].mxu0  ;;  %v2172_v63 = vpop.f32.mrb[12].mxu1  ;;  %1579 = vrcp.f32 %v1036_v55  ;;  %v1034_v3 = vadd.f32 1.0, %v1562_v58  ;;  %v1347_v33 = vmul.f32 -1.442695, %v2190_v17  ;;  %v2203_v42 = vadd.f32 %v2069_v36, %v877_v28 }
 0x166   : > { %v1564_v0 = vpop.eup %1563  ;;  %v2178_v6 = vpop.f32.mrb[13].mxu0  ;;  %1581 = vrcp.f32 %v1018_v61  ;;  %v1336_v54 = vmul.f32 -1.442695, %v2200_v39  ;;  %v859_v58 = vmul.f32 %v2062_v29, %v820_v45  ;;  %v836_v61 = vadd.f32 %v2057_v25, %v2132_v26 }
 0x167   : > { %v2180_v7 = vpop.f32.mrb[13].mxu1  ;;  %v1566_v8 = vpop.eup %1565  ;;  %v1021_v9 = vadd.f32 1.0, %v1564_v0  ;;  %1583 = vrcp.f32 %v1034_v3  ;;  %v1352_v55 = vmul.f32 -1.442695, %v2203_v42 }
 0x168   : > { %v2184_v12 = vpop.f32.mrb[14].mxu0  ;;  %v2186_v13 = vpop.f32.mrb[14].mxu1  ;;  %v1037_v15 = vadd.f32 1.0, %v1566_v8 }
 0x169   : > { %v1568_v14 = vpop.eup %1567  ;;  %v2192_v18 = vpop.f32.mrb[15].mxu0  ;;  %1585 = vrcp.f32 %v1021_v9  ;;  %v875_v9 = vmul.f32 %v2062_v29, %v836_v61 }
 0x16a   : > { %v2194_v22 = vpop.f32.mrb[15].mxu1  ;;  %v1570_v19 = vpop.eup %1569  ;;  %v1019_v20 = vadd.f32 1.0, %v1568_v14  ;;  %1587 = vrcp.f32 %v1037_v15 }
 0x16b   : > { %v1035_v30 = vadd.f32 1.0, %v1570_v19  ;;  %v1572_v43 = vpop.eup %1571 }
 0x16c   : > { %1589 = vrcp.f32 %v1019_v20  ;;  %v1574_v46 = vpop.eup %1573  ;;  %v1024_v49 = vadd.f32 1.0, %v1572_v43  ;;  %v2237_v20 = vadd.f32 %v2069_v36, %v862_v11 }
 0x16d   : > { %1591 = vrcp.f32 %v1035_v30  ;;  %v1576_v56 = vpop.eup %1575  ;;  %v1040_v57 = vadd.f32 1.0, %v1574_v46 }
 0x16e   : > { %1593 = vpow2.f32 %v1346_v44  ;;  %v1578_v0 = vpop.eup %1577  ;;  %v1022_v3 = vadd.f32 1.0, %v1576_v56  ;;  %v839_v44 = vadd.f32 %v2141_v32, %v2057_v25 }
 0x16f   : > { %1595 = vpow2.f32 %v1333_v50  ;;  %v1580_v5 = vpop.eup %1579  ;;  %v1116_v8 = vmul.f32 %v1578_v0, %v2082_v47  ;;  %v2219_v50 = vadd.f32 %v2069_v36, %v859_v58 }
 0x170   : > { %1597 = vrcp.f32 %v1024_v49  ;;  %v1582_v10 = vpop.eup %1581  ;;  %v1132_v26 = vmul.f32 %v1580_v5, %v2085_v48  ;;  %v878_v31 = vmul.f32 %v2062_v29, %v839_v44  ;;  %v2232_v48 = vadd.f32 %v2069_v36, %v875_v9 }
 0x171   : > { %1599 = vrcp.f32 %v1040_v57  ;;  %v1584_v14 = vpop.eup %1583  ;;  %1148 = vst [vmem:[%s2225_s11 + $0x10] sm:$0xff] %v1116_v8  ;;  %v1114_v47 = vmul.f32 %v1582_v10, %v2090_v51  ;;  %v1334_v32 = vmul.f32 -1.442695, %v2219_v50  ;;  %v837_v57 = vadd.f32 %v2057_v25, %v2152_v38 }
 0x172   : > { %1601 = vrcp.f32 %v1022_v3  ;;  %1164 = vst [vmem:[%s2225_s11 + $0x90] sm:$0xff] %v1132_v26  ;;  %v1130_v19 = vmul.f32 %v1584_v14, %v2093_v52  ;;  %v2240_v23 = vadd.f32 %v2069_v36, %v878_v31  ;;  %v1350_v28 = vmul.f32 -1.442695, %v2232_v48 }
 0x173   : > { %1603 = vpow2.f32 %v2166_v53  ;;  %v1586_v15 = vpop.eup %1585  ;;  %1146 = vst [vmem:[%s2225_s11] sm:$0xff] %v1114_v47  ;;  %v876_v38 = vmul.f32 %v2062_v29, %v837_v57 }
 0x174   : > { %1605 = vpow2.f32 %v1331_v16  ;;  %v1588_v51 = vpop.eup %1587  ;;  %v1117_v53 = vmul.f32 %v1586_v15, %v2100_v59  ;;  %1162 = vst [vmem:[%s2225_s11 + $0x80] sm:$0xff] %v1130_v19  ;;  %v1337_v16 = vmul.f32 -1.442695, %v2237_v20  ;;  %v1353_v43 = vmul.f32 -1.442695, %v2240_v23 }
 0x175   : > { %1607 = vpow2.f32 %v1347_v33  ;;  %v1133_v52 = vmul.f32 %v1588_v51, %v2103_v60  ;;  %v821_v59 = vadd.f32 %v2057_v25, %v2150_v37  ;;  %v826_v37 = vadd.f32 %v2170_v62, %v2057_v25 }
 0x176   : > { %v1590_v30 = vpop.eup %1589  ;;  %1609 = vpow2.f32 %v1336_v54  ;;  %1149 = vst [vmem:[%s2225_s11 + $0x18] sm:$0xff] %v1117_v53  ;;  %v2276_v8 = vadd.f32 %v2069_v36, %v876_v38  ;;  %v824_v51 = vadd.f32 %v2057_v25, %v2178_v6  ;;  %v840_v53 = vadd.f32 %v2057_v25, %v2180_v7 }
 0x177   : > { %v1592_v45 = vpop.eup %1591  ;;  %v1115_v46 = vmul.f32 %v1590_v30, %v2108_v1  ;;  %1611 = vpow2.f32 %v1352_v55  ;;  %1165 = vst [vmem:[%s2225_s11 + $0x98] sm:$0xff] %v1133_v52  ;;  %v860_v56 = vmul.f32 %v2062_v29, %v821_v59  ;;  %v865_v62 = vmul.f32 %v2062_v29, %v826_v37 }
 0x178   : > { %v1594_v33 = vpop.eup %1593  ;;  %v1131_v49 = vmul.f32 %v1592_v45, %v2111_v2  ;;  %1613 = vpow2.f32 %v1334_v32  ;;  %v842_v2 = vadd.f32 %v2172_v63, %v2057_v25  ;;  %v1351_v47 = vmul.f32 -1.442695, %v2276_v8 }
 0x179   : > { %v1596_v60 = vpop.eup %1595  ;;  %1147 = vst [vmem:[%s2225_s11 + $0x8] sm:$0xff] %v1115_v46  ;;  %v1038_v54 = vadd.f32 1.0, %v1594_v33  ;;  %1615 = vpow2.f32 %v1350_v28  ;;  %v2266_v0 = vadd.f32 %v2069_v36, %v860_v56  ;;  %v879_v45 = vmul.f32 %v2062_v29, %v840_v53 }
 0x17a   : > { %v1598_v58 = vpop.eup %1597  ;;  %1163 = vst [vmem:[%s2225_s11 + $0x88] sm:$0xff] %v1131_v49  ;;  %v1025_v1 = vadd.f32 1.0, %v1596_v60  ;;  %1617 = vpow2.f32 %v1337_v16  ;;  %v881_v44 = vmul.f32 %v2062_v29, %v842_v2  ;;  %v827_v33 = vadd.f32 %v2184_v12, %v2057_v25 }
 0x17b   : > { %v1600_v55 = vpop.eup %1599  ;;  %v1120_v61 = vmul.f32 %v1598_v58, %v2126_v21  ;;  %1619 = vrcp.f32 %v1038_v54  ;;  %v1335_v5 = vmul.f32 -1.442695, %v2266_v0  ;;  %v843_v6 = vadd.f32 %v2186_v13, %v2057_v25 }
 0x17c   : > { %v1602_v3 = vpop.eup %1601  ;;  %v1136_v24 = vmul.f32 %v1600_v55, %v2135_v27  ;;  %1621 = vrcp.f32 %v1025_v1  ;;  %v2280_v27 = vadd.f32 %v2069_v36, %v865_v62  ;;  %v2284_v31 = vadd.f32 %v2069_v36, %v881_v44 }
 0x17d   : > { %v1604_v63 = vpop.eup %1603  ;;  %1152 = vst [vmem:[%s2225_s11 + $0x30] sm:$0xff] %v1120_v61  ;;  %v1118_v21 = vmul.f32 %v1602_v3, %v2145_v34  ;;  %1623 = vpow2.f32 %v1353_v43  ;;  %v863_v43 = vmul.f32 %v2062_v29, %v824_v51  ;;  %v2302_v54 = vadd.f32 %v2069_v36, %v879_v45 }
 0x17e   : > { %v1606_v9 = vpop.eup %1605  ;;  %1168 = vst [vmem:[%s2225_s11 + $0xb0] sm:$0xff] %v1136_v24  ;;  %v1041_v10 = vadd.f32 1.0, %v1604_v63  ;;  %1625 = vpow2.f32 %v1335_v5  ;;  %v1340_v32 = vmul.f32 -1.442695, %v2280_v27  ;;  %v866_v12 = vmul.f32 %v2062_v29, %v827_v33 }
 0x17f   : > { %v1608_v26 = vpop.eup %1607  ;;  %1150 = vst [vmem:[%s2225_s11 + $0x20] sm:$0xff] %v1118_v21  ;;  %v1023_v11 = vadd.f32 1.0, %v1606_v9  ;;  %v2299_v60 = vadd.f32 %v2069_v36, %v863_v43  ;;  %v882_v58 = vmul.f32 %v2062_v29, %v843_v6  ;;  %v1356_v37 = vmul.f32 -1.442695, %v2284_v31 }
 0x180   : > { %v1610_v34 = vpop.eup %1609  ;;  %1627 = vrcp.f32 %v1041_v10  ;;  %v1039_v14 = vadd.f32 1.0, %v1608_v26  ;;  %v2311_v55 = vadd.f32 %v2069_v36, %v866_v12  ;;  %v1354_v24 = vmul.f32 -1.442695, %v2302_v54 }
 0x181   : > { %v1612_v15 = vpop.eup %1611  ;;  %1629 = vrcp.f32 %v1023_v11  ;;  %v1028_v19 = vadd.f32 1.0, %v1610_v34  ;;  %v2314_v61 = vadd.f32 %v2069_v36, %v882_v58  ;;  %v1338_v38 = vmul.f32 -1.442695, %v2299_v60 }
 0x182   : > { %v1614_v28 = vpop.eup %1613  ;;  %1631 = vrcp.f32 %v1039_v14  ;;  %v1044_v30 = vadd.f32 1.0, %v1612_v15  ;;  %v1341_v62 = vmul.f32 -1.442695, %v2311_v55  ;;  %v825_v21 = vadd.f32 %v2057_v25, %v2192_v18 }
 0x183   : > { %v1616_v52 = vpop.eup %1615  ;;  %1633 = vrcp.f32 %v1028_v19  ;;  %v1026_v16 = vadd.f32 1.0, %v1614_v28  ;;  %v841_v5 = vadd.f32 %v2057_v25, %v2194_v22  ;;  %v1357_v26 = vmul.f32 -1.442695, %v2314_v61 }
 0x184   : > { %v1618_v46 = vpop.eup %1617  ;;  %1635 = vrcp.f32 %v1044_v30  ;;  %v1042_v59 = vadd.f32 1.0, %v1616_v52 }
 0x185   : > { %v1620_v7 = vpop.eup %1619  ;;  %1637 = vrcp.f32 %v1026_v16  ;;  %v1029_v49 = vadd.f32 1.0, %v1618_v46  ;;  %v880_v18 = vmul.f32 %v2062_v29, %v841_v5 }
 0x186   : > { %v1622_v56 = vpop.eup %1621  ;;  %v1134_v57 = vmul.f32 %v1620_v7, %v2148_v35  ;;  %1639 = vrcp.f32 %v1042_v59 }
 0x187   : > { %v1624_v1 = vpop.eup %1623  ;;  %v1121_v13 = vmul.f32 %v1622_v56, %v2156_v40  ;;  %1641 = vrcp.f32 %v1029_v49 }
 0x188   : > { %1166 = vst [vmem:[%s2225_s11 + $0xa0] sm:$0xff] %v1134_v57  ;;  %v1045_v2 = vadd.f32 1.0, %v1624_v1  ;;  %1643 = vpow2.f32 %v1351_v47  ;;  %v1626_v35 = vpop.eup %1625  ;;  %v2339_v47 = vadd.f32 %v2069_v36, %v880_v18 }
 0x189   : > { %1153 = vst [vmem:[%s2225_s11 + $0x38] sm:$0xff] %v1121_v13  ;;  %1645 = vpow2.f32 %v1340_v32  ;;  %v1027_v40 = vadd.f32 1.0, %v1626_v35 }
 0x18a   : > { %v1628_v3 = vpop.eup %1627  ;;  %1647 = vrcp.f32 %v1045_v2  ;;  %v1355_v19 = vmul.f32 -1.442695, %v2339_v47 }
 0x18b   : > { %v1630_v44 = vpop.eup %1629  ;;  %v1137_v63 = vmul.f32 %v1628_v3, %v2159_v41  ;;  %1649 = vpow2.f32 %v1356_v37  ;;  %v864_v41 = vmul.f32 %v2062_v29, %v825_v21 }
 0x18c   : > { %v1632_v9 = vpop.eup %1631  ;;  %v1119_v10 = vmul.f32 %v1630_v44, %v2175_v4  ;;  %1651 = vrcp.f32 %v1027_v40 }
 0x18d   : > { %v1634_v11 = vpop.eup %1633  ;;  %1169 = vst [vmem:[%s2225_s11 + $0xb8] sm:$0xff] %v1137_v63  ;;  %v1135_v34 = vmul.f32 %v1632_v9, %v2190_v17  ;;  %1653 = vpow2.f32 %v1338_v38  ;;  %v2336_v17 = vadd.f32 %v2069_v36, %v864_v41 }
 0x18e   : > { %v1636_v14 = vpop.eup %1635  ;;  %1151 = vst [vmem:[%s2225_s11 + $0x28] sm:$0xff] %v1119_v10  ;;  %v1124_v25 = vmul.f32 %v1634_v11, %v2200_v39  ;;  %1655 = vpow2.f32 %v1354_v24 }
 0x18f   : > { %v1638_v4 = vpop.eup %1637  ;;  %1167 = vst [vmem:[%s2225_s11 + $0xa8] sm:$0xff] %v1135_v34  ;;  %v1140_v22 = vmul.f32 %v1636_v14, %v2203_v42  ;;  %1657 = vpow2.f32 %v1341_v62  ;;  %v1339_v42 = vmul.f32 -1.442695, %v2336_v17 }
 0x190   : > { %v1640_v29 = vpop.eup %1639  ;;  %1156 = vst [vmem:[%s2225_s11 + $0x50] sm:$0xff] %v1124_v25  ;;  %v1122_v32 = vmul.f32 %v1638_v4, %v2219_v50  ;;  %1659 = vpow2.f32 %v1357_v26 }
 0x191   : > { %v1642_v39 = vpop.eup %1641  ;;  %1172 = vst [vmem:[%s2225_s11 + $0xd0] sm:$0xff] %v1140_v22  ;;  %v1138_v15 = vmul.f32 %v1640_v29, %v2232_v48  ;;  %1661 = vpow2.f32 %v1339_v42 }
 0x192   : > { %v1644_v51 = vpop.eup %1643  ;;  %1154 = vst [vmem:[%s2225_s11 + $0x40] sm:$0xff] %v1122_v32  ;;  %v1125_v53 = vmul.f32 %v1642_v39, %v2237_v20  ;;  %1663 = vpow2.f32 %v1355_v19 }
 0x193   : > { %v1646_v36 = vpop.eup %1645  ;;  %1170 = vst [vmem:[%s2225_s11 + $0xc0] sm:$0xff] %v1138_v15  ;;  %v1043_v28 = vadd.f32 1.0, %v1644_v51 }
 0x194   : > { %v1648_v30 = vpop.eup %1647  ;;  %1157 = vst [vmem:[%s2225_s11 + $0x58] sm:$0xff] %v1125_v53  ;;  %v1032_v50 = vadd.f32 1.0, %v1646_v36 }
 0x195   : > { %v1650_v52 = vpop.eup %1649  ;;  %v1141_v48 = vmul.f32 %v1648_v30, %v2240_v23  ;;  %1665 = vrcp.f32 %v1043_v28 }
 0x196   : > { %v1652_v16 = vpop.eup %1651  ;;  %1667 = vrcp.f32 %v1032_v50  ;;  %v1048_v43 = vadd.f32 1.0, %v1650_v52 }
 0x197   : > { %v1654_v45 = vpop.eup %1653  ;;  %1173 = vst [vmem:[%s2225_s11 + $0xd8] sm:$0xff] %v1141_v48  ;;  %v1123_v20 = vmul.f32 %v1652_v16, %v2266_v0 }
 0x198   : > { %v1656_v46 = vpop.eup %1655  ;;  %1669 = vrcp.f32 %v1048_v43  ;;  %v1030_v59 = vadd.f32 1.0, %v1654_v45 }
 0x199   : > { %v1658_v33 = vpop.eup %1657  ;;  %1155 = vst [vmem:[%s2225_s11 + $0x48] sm:$0xff] %v1123_v20  ;;  %v1046_v6 = vadd.f32 1.0, %v1656_v46 }
 0x19a   : > { %v1660_v7 = vpop.eup %1659  ;;  %1671 = vrcp.f32 %v1030_v59  ;;  %v1033_v49 = vadd.f32 1.0, %v1658_v33 }
 0x19b   : > { %1673 = vrcp.f32 %v1046_v6  ;;  %v1049_v23 = vadd.f32 1.0, %v1660_v7  ;;  %v1662_v56 = vpop.eup %1661 }
 0x19c   : > { %1675 = vrcp.f32 %v1033_v49  ;;  %v1664_v57 = vpop.eup %1663  ;;  %v1031_v12 = vadd.f32 1.0, %v1662_v56 }
 0x19d   : > { %1677 = vrcp.f32 %v1049_v23  ;;  %v1047_v58 = vadd.f32 1.0, %v1664_v57 }
 0x19e   : > { %1679 = vrcp.f32 %v1031_v12 }
 0x19f   : > { %v1666_v0 = vpop.eup %1665  ;;  %1681 = vrcp.f32 %v1047_v58 }
 0x1a0   : > { %v1668_v1 = vpop.eup %1667  ;;  %v1139_v13 = vmul.f32 %v1666_v0, %v2276_v8 }
 0x1a1   : > { %v1128_v37 = vmul.f32 %v1668_v1, %v2280_v27 }
 0x1a2   : > { %v1670_v2 = vpop.eup %1669  ;;  %1171 = vst [vmem:[%s2225_s11 + $0xc8] sm:$0xff] %v1139_v13 }
 0x1a3   : > { %1160 = vst [vmem:[%s2225_s11 + $0x70] sm:$0xff] %v1128_v37  ;;  %v1144_v35 = vmul.f32 %v1670_v2, %v2284_v31 }
 0x1a4   : > { %v1672_v38 = vpop.eup %1671 }
 0x1a5   : > { %v1674_v3 = vpop.eup %1673  ;;  %1176 = vst [vmem:[%s2225_s11 + $0xf0] sm:$0xff] %v1144_v35  ;;  %v1126_v40 = vmul.f32 %v1672_v38, %v2299_v60 }
 0x1a6   : > { %v1676_v8 = vpop.eup %1675  ;;  %v1142_v24 = vmul.f32 %v1674_v3, %v2302_v54 }
 0x1a7   : > { %v1678_v27 = vpop.eup %1677  ;;  %1158 = vst [vmem:[%s2225_s11 + $0x60] sm:$0xff] %v1126_v40  ;;  %v1129_v62 = vmul.f32 %v1676_v8, %v2311_v55 }
 0x1a8   : > { %1174 = vst [vmem:[%s2225_s11 + $0xe0] sm:$0xff] %v1142_v24  ;;  %v1145_v44 = vmul.f32 %v1678_v27, %v2314_v61  ;;  %v1680_v31 = vpop.eup %1679 }
 0x1a9   : > { %1161 = vst [vmem:[%s2225_s11 + $0x78] sm:$0xff] %v1129_v62  ;;  %v1682_v60 = vpop.eup %1681  ;;  %v1127_v63 = vmul.f32 %v1680_v31, %v2336_v17 }
 0x1aa   : > { %1177 = vst [vmem:[%s2225_s11 + $0xf8] sm:$0xff] %v1145_v44  ;;  %v1143_v54 = vmul.f32 %v1682_v60, %v2339_v47 }
 0x1ab   : > { %1159 = vst [vmem:[%s2225_s11 + $0x68] sm:$0xff] %v1127_v63 }
 0x1ac   : > { %1175 = vst [vmem:[%s2225_s11 + $0xe8] sm:$0xff] %v1143_v54 }
 0x1ad   : > { %1754 = shalt.err (!%p1751_p5)
}
 0x1ae   : > { %s1755_s24 = scalar_lea.hbm %s2375_s7, 4096  ;;  %s1759_s13 = scalar_lea.hbm %s2434_s5, 8192 }
 0x1af   : > { %p1756_p9 = scmp.ne.s32.totalorder %s2375_s7, %s1755_s24  ;;  %p1760_p3 = scmp.lt.u32.totalorder %s2375_s7, %s2434_s5 }
 0x1b0   : > { %p1761_p7 = scmp.lt.u32.totalorder %s1759_s13, %s1755_s24  ;;  %p1763_p4 = scmp.lt.u32.totalorder %s1755_s24, %s2375_s7 }
 0x1b1   : > { %p1757_p1 = pnand %p1756_p9, %p1965_p10 }
 0x1b2   : > { %p1762_p13 = por %p1761_p7, %p1760_p3 }
 0x1b3   : > { %p1758_p2 = pneg %p1757_p1 }
 0x1b4   : > { %p1764_p6 = por %p1763_p4, %p1762_p13 }
 0x1b6   : > { %p1765_p8 = pnand %p1764_p6, %p1758_p2 }
 0x1b8   : > { %1768 = shalt.err (!%p1765_p8)
}
 0x1b9   : > { %s1834_s17 = smov 128   ;;  %s1835_s27 = smov 8  }
 0x1ba   : > { %1459 = dma.vmem_to_hbm [thread:$0]  (%p1965_p10), %s2377_s6, 4096, %s2375_s7, %s1179_s21, %s1834_s17, %s1834_s17, %s1835_s27  }
 0x1bb PF: > { %s1207_s14 = sand.u32 1, %s1807_s18   ;;  %p2454_p12 = scmp.ne.s32.totalorder %s2443_s29, 0 }
 0x1bc   : > { %p2455_p11 = scmp.ge.s32.totalorder %s1827_s23, 2  ;;  %s1208_s26 = scalar_lea.sflag [#allocation4], %s1207_s14 }
 0x1be   : > { %p1470_p0 = pnand %p2455_p11, %p2454_p12 }
 0x1c0   : > { %1802 = dma.done.wait (!%p1470_p0), %s1208_s26, 4096  }
 0x1c1   : > { %1804 = vsyncadd (!%p1470_p0), %s1208_s26, 4294963200  ;;  %s22_s23 = sadd.s32 1, %s1827_s23   ;;  %s2456_s18 = smov %s1811_s19 }
 0x1c2   : > { %p19_p5 = scmp.ge.s32.totalorder %s22_s23, 4   ;;  %s2457_s19 = smov %s1815_s20 }
 0x1c3   : > { %s2458_s20 = smov %s1974_s15  ;;  %s2459_s21 = smov %s1823_s22 }
 0x1c4   : > { %s2460_s22 = smov %s2462_s9  ;;  %21 = sbr.rel (!%p19_p5) target bundleno = 7 (0x7), region = 98 }
 0x1cb   :  { %1213 = vsyncpa [#allocation3], 1 }
 0x1cc   :  { %1215 = vsyncpa [#allocation3 + $0x1], 1 }
 0x1cd   :  { %1216 = vsyncpa [#allocation6], 1 }
 0x1ce   :  { %1217 = vsyncpa [#allocation4], 1 }
 0x1cf   :  { %1219 = vsyncpa [#allocation4 + $0x1], 1 }

</bundles_post_ra>
